<compile_context>
chip_gen: v7x
topology: tpu7x:2x2x1
jax: 0.10.0
libtpu: 0.0.40
codegen_flags: <defaults>
</compile_context>

<pallas_src>
import jax
import jax.numpy as jnp
from jax.experimental import pallas as pl
from jax.experimental.pallas import tpu as pltpu


def _linear_sigmoid_kernel(x_ref, w_ref, b_ref, o_ref):
    # x_ref: (TB, L), w_ref: (L, 1), b_ref: (1, 1), o_ref: (TB, 1)
    acc = jnp.dot(x_ref[...], w_ref[...], preferred_element_type=jnp.float32)
    o_ref[...] = jax.nn.sigmoid(acc + b_ref[...]).astype(o_ref.dtype)


_GRIDLESS_MAX_X_BYTES = 1 << 20   # activations up to ~1 MiB: single VMEM-resident call
_TILE_ELEMS = 256 * 1024          # ~1 MiB f32 per batch tile in the gridded path


def domain_discriminator0(input_features, w, b, alpha=1.0):
    """Forward of DomainDiscriminator0.

    input_features: [B, L] float32, w: [L, 1] float32, b: [1] float32 -> [B, 1].
    `alpha` only affects the backward pass (gradient reversal); the forward is
    the identity, so it is accepted for signature parity but unused here.
    """
    del alpha  # forward-pass identity; only scales gradients in backward
    x = input_features
    B, L = x.shape
    L2, O = w.shape
    assert L == L2 and O == 1 and b.shape == (O,)
    b2 = b.reshape(1, O)

    cost = pl.CostEstimate(
        flops=2 * B * L * O,
        transcendentals=B * O,
        bytes_accessed=4 * (B * L + L * O + O + B * O),
    )

    x_bytes = B * L * x.dtype.itemsize

    if x_bytes <= _GRIDLESS_MAX_X_BYTES:
        # Grid-less path: whole problem in one VMEM-resident invocation --
        # no pipeline prologue/epilogue machinery for a kernel that is all overhead.
        return pl.pallas_call(
            _linear_sigmoid_kernel,
            out_shape=jax.ShapeDtypeStruct((B, O), jnp.float32),
            in_specs=[
                pl.BlockSpec(memory_space=pltpu.MemorySpace.VMEM),
                pl.BlockSpec(memory_space=pltpu.MemorySpace.VMEM),
                pl.BlockSpec(memory_space=pltpu.MemorySpace.VMEM),
            ],
            out_specs=pl.BlockSpec(memory_space=pltpu.MemorySpace.VMEM),
            cost_estimate=cost,
        )(x, w, b2)

    # Batch-tiled path for large batches: ~1 MiB per tile, multiple of 8 sublanes,
    # cdiv grid handles any B (partial final tile is padded/masked by Pallas).
    tb = max(8, min(B, _TILE_ELEMS // L))
    tb = (tb // 8) * 8
    grid = (pl.cdiv(B, tb),)

    return pl.pallas_call(
        _linear_sigmoid_kernel,
        out_shape=jax.ShapeDtypeStruct((B, O), jnp.float32),
        grid=grid,
        in_specs=[
            pl.BlockSpec((tb, L), lambda i: (i, 0)),
            pl.BlockSpec((L, O), lambda i: (0, 0)),   # weight stays VMEM-resident
            pl.BlockSpec((1, O), lambda i: (0, 0)),   # bias stays VMEM-resident
        ],
        out_specs=pl.BlockSpec((tb, O), lambda i: (i, 0)),
        compiler_params=pltpu.CompilerParams(
            dimension_semantics=("parallel",),
        ),
        cost_estimate=cost,
    )(x, w, b2)


def reference(x, w, b):
    return jax.nn.sigmoid(x @ w + b[None, :])


if __name__ == "__main__":
    L = 16  # opt.latent_dim

    key = jax.random.PRNGKey(0)
    kx, kw, kb, kx2 = jax.random.split(key, 4)

    # PyTorch-Linear-style uniform init; PyTorch weight is [1, L], stored as [L, 1].
    bound = 1.0 / (L ** 0.5)
    w = jax.random.uniform(kw, (L, 1), jnp.float32, minval=-bound, maxval=bound)
    b = jax.random.uniform(kb, (1,), jnp.float32, minval=-bound, maxval=bound)

    # Small-batch path (grid-less, single VMEM-resident call).
    B = 8
    x = jax.random.normal(kx, (B, L), jnp.float32)
    out = jax.block_until_ready(domain_discriminator0(x, w, b, alpha=0.5))
    ref = reference(x, w, b)
    assert out.shape == (B, 1)
    assert jnp.allclose(out, ref, atol=1e-5, rtol=1e-5), "small-batch mismatch"

    # Large-batch path (batch-tiled grid, 'parallel' over batch, partial last tile).
    B2 = 16392  # > 1 MiB of activations and not a multiple of the tile -> cdiv grid
    x2 = jax.random.normal(kx2, (B2, L), jnp.float32)
    out2 = jax.block_until_ready(domain_discriminator0(x2, w, b, alpha=0.5))
    ref2 = reference(x2, w, b)
    assert out2.shape == (B2, 1)
    assert jnp.allclose(out2, ref2, atol=1e-5, rtol=1e-5), "large-batch mismatch"

    # TODO(synk): ReverseLayerF only negates/scales gradients in backward; no
    # forward-pass op exists to translate, so alpha is accepted but unused.
    print("KERNEL_OK")
</pallas_src>

<mosaic_0001>
module attributes {stable_mosaic.version = 11 : i64} {
  func.func @_linear_sigmoid_kernel(%arg0: memref<8x16xf32, #tpu.memory_space<vmem>>, %arg1: memref<16x1xf32, #tpu.memory_space<vmem>>, %arg2: memref<1x1xf32, #tpu.memory_space<vmem>>, %arg3: memref<8x1xf32, #tpu.memory_space<vmem>>) attributes {dimension_semantics = [], scalar_prefetch = 0 : i64, scratch_operands = 0 : i64, tpu.core_type = #tpu.core_type<tc>} {
    %c0 = arith.constant 0 : index
    %c0_0 = arith.constant 0 : index
    %0 = vector.load %arg0[%c0, %c0_0] : memref<8x16xf32, #tpu.memory_space<vmem>>, vector<8x16xf32>
    %c0_1 = arith.constant 0 : index
    %c0_2 = arith.constant 0 : index
    %1 = vector.load %arg1[%c0_1, %c0_2] : memref<16x1xf32, #tpu.memory_space<vmem>>, vector<16x1xf32>
    %cst = arith.constant dense<0.000000e+00> : vector<8x1xf32>
    %2 = tpu.matmul %0, %1, %cst {dimension_numbers = #tpu.dot_dimension_numbers<[1], [0], [0], [1], [0, 0, 1, 1], [], []>} : vector<8x16xf32>, vector<16x1xf32>, vector<8x1xf32> -> vector<8x1xf32>
    %c0_3 = arith.constant 0 : index
    %c0_4 = arith.constant 0 : index
    %3 = vector.load %arg2[%c0_3, %c0_4] : memref<1x1xf32, #tpu.memory_space<vmem>>, vector<1x1xf32>
    %4 = vector.broadcast %3 : vector<1x1xf32> to vector<8x1xf32>
    %5 = arith.addf %2, %4 : vector<8x1xf32>
    %6 = arith.negf %5 : vector<8x1xf32>
    %7 = math.exp %6 : vector<8x1xf32>
    %cst_5 = arith.constant 1.000000e+00 : f32
    %8 = vector.broadcast %cst_5 : f32 to vector<8x1xf32>
    %9 = arith.addf %8, %7 : vector<8x1xf32>
    %10 = arith.divf %8, %9 : vector<8x1xf32>
    %c0_6 = arith.constant 0 : index
    %c0_7 = arith.constant 0 : index
    %11 = vector.load %arg3[%c0_6, %c0_7] : memref<8x1xf32, #tpu.memory_space<vmem>>, vector<8x1xf32>
    tpu.vector_store %arg3[%c0_6, %c0_7], %10 {strides = array<i32>} : memref<8x1xf32, #tpu.memory_space<vmem>>, vector<8x1xf32>,
    return
  }
}

</mosaic_0001>

<bundles_post_ra>
// kernel: tpu_custom_call.1
= control target key start
LH: loop header
LB: loop body
LE: loop exit
PB: predicated region body
PF: predicated region fallthrough
CT: control target
= control target key end

     0   :  { %v135_v0 = vmov 0.0|0.0   ;;  %vm136_vm0 = vmmov 0   ;;  %v137_v3 = vmov 0.0   ;;  %vm26_vm1 = vcmask 130048   ;;  %s173_s1 = inlined_call_operand.vmem [shape: f32[16,1], index: 1, kind: input, shape index: {}]   ;;  %s174_s2 = inlined_call_operand.<no memory space> [shape: f32[1,1], index: 2, kind: input, shape index: {}]   ;;  %s175_s0 = inlined_call_operand.vmem [shape: f32[8,16], index: 0, kind: input, shape index: {}]   ;;  %s176_s3 = inlined_call_operand.vmem [shape: f32[8,1], index: 3, kind: output, shape index: {}]  }
   0x1   :  { %125 = vmatprep.subr.bf16.mxu0 %v135_v0  ;;  %v17_v1 = vld [vmem:[%s173_s1] sm:$0xff]  ;;  %v18_v2 = vld [vmem:[%s173_s1 + $0x8] sm:$0xff]  ;;  %122 = vmatprep.mubr.msk.f32.mxu0 %vm136_vm0, %v137_v3  ;;  %v8_v4 = vstv %s174_s2  ;;  %vm106_vm2 = vcmask 7168  }
   0x2   :  { %v126_v5 = vpack.c.bf16 %v18_v2, %v17_v1  ;;  %9 = vst [vmem:[#allocation2] sm:$0x1] %v8_v4  ;;  %v16_v6 = vld [vmem:[%s175_s0] sm:$0xff] }
   0x4   :  { %127 = vmatpush3.bf16.msra.mxu0 %v126_v5 }
   0x7   :  { %123 = vmatmul.mubr.msk.f32.vlgmr.msra.gmra.mrb[0].mxu0 %vm26_vm1, %v16_v6 }
   0x9   :  { %v112_v7 = vld [vmem:[#allocation2] ss:$0 sm:$0xff] }
  0xda   :  { %v96_v8 = vpop.f32.mrb[0].mxu0 }
  0xdb   :  { %v97_v9 = vadd.f32 %v112_v7, %v96_v8  ;;  %v124_v10 = vpop.f32.mrb[1].mxu0 }
  0xdd   :  { %v114_v11 = vmul.f32 -1.442695, %v97_v9 }
  0xdf   :  { %131 = vpow2.f32 %v114_v11 }
  0xe9   :  { %v132_v12 = vpop.eup %131 }
  0xea   :  { %v103_v13 = vadd.f32 1.0, %v132_v12 }
  0xec   :  { %133 = vrcp.f32 %v103_v13 }
  0xf6   :  { %v134_v14 = vpop.eup %133 }
  0xf7   :  { %107 = vst.msk [vmem:[%s176_s3] sm:$0xff] %vm106_vm2, %v134_v14 }

</bundles_post_ra>
